<compile_context>
chip_gen: v5e
topology: v5e:2x2
jax: 0.10.0
libtpu: 0.0.40
codegen_flags: <defaults>
</compile_context>

<pallas_src>
import math
import functools

import jax
import jax.numpy as jnp
import numpy as np
from jax.experimental import pallas as pl
from jax.experimental.pallas import tpu as pltpu


# --------------------------------------------------------------------------- #
# Host-side glue: hashed id -> per-shift row indices (exact torch semantics).  #
# --------------------------------------------------------------------------- #
def _row_indices_np(ids_i64, num_embeddings, num_shifts, num_bits=64):
    """(...,) int64 hashed ids -> (B, num_shifts) int32 row indices.

    Per shift c reproduces
        x_c = (x << c) | (x >> (num_bits - c))     # int64: wrapping <<, arithmetic >>
        idx = torch.remainder(x_c, num_embeddings) # python-style mod
    with numpy uint64 arithmetic, so no global x64 flag is needed.
    """
    ids = np.ascontiguousarray(np.asarray(ids_i64, dtype=np.int64)).reshape(-1)
    u = ids.view(np.uint64)
    sign = (u >> np.uint64(num_bits - 1)).astype(bool)
    ones = np.uint64(0xFFFFFFFFFFFFFFFF)
    cols = []
    for c in range(num_shifts):
        if c == 0:
            patt = u
        else:
            left = u << np.uint64(c)                                   # wraps mod 2**64
            right = u >> np.uint64(num_bits - c)                       # logical part of arith >>
            fill = np.where(sign, ones << np.uint64(c), np.uint64(0))  # sign extension bits
            patt = left | right | fill
        signed = patt.view(np.int64)
        cols.append(np.mod(signed, np.int64(num_embeddings)))          # floor mod, in [0, N)
    return np.stack(cols, axis=-1).astype(np.int32)


# --------------------------------------------------------------------------- #
# Kernels                                                                      #
# --------------------------------------------------------------------------- #
def _kshift_matmul_kernel(idx_ref, emb_ref, out_ref, *, num_shifts, num_embeddings,
                          normalize_output, inv_sqrt_shifts):
    """Small-table path: one-hot counts @ table on the MXU (== sum of gathered rows)."""
    idx = idx_ref[...]                                    # (bb, S) int32
    emb = emb_ref[...].astype(jnp.float32)                # (N, D)
    bb = idx.shape[0]

    col = jax.lax.broadcasted_iota(jnp.int32, (bb, num_embeddings), 1)
    counts = jnp.zeros((bb, num_embeddings), jnp.float32)
    for s in range(num_shifts):                           # static unroll, S is small
        counts = counts + (col == idx[:, s:s + 1]).astype(jnp.float32)

    x = jnp.dot(counts, emb, preferred_element_type=jnp.float32)
    if normalize_output:
        ss = jnp.sum(x * x, axis=-1, keepdims=True)
        x = x * jax.lax.rsqrt(jnp.maximum(ss, 1e-24))     # == x / max(||x||, 1e-12)
    else:
        x = x * inv_sqrt_shifts
    out_ref[...] = x


def _kshift_gather_kernel(idx_ref, emb_ref, out_ref, *, block_b, num_shifts,
                          normalize_output, inv_sqrt_shifts):
    """Large-table path: SMEM scalar-indexed gather, summing num_shifts rows per output row."""
    base = pl.program_id(0) * (block_b * num_shifts)

    def row_body(b, carry):
        off = base + b * num_shifts
        acc = emb_ref[pl.ds(idx_ref[off], 1), :].astype(jnp.float32)
        for s in range(1, num_shifts):                    # static unroll over shifts
            acc = acc + emb_ref[pl.ds(idx_ref[off + s], 1), :].astype(jnp.float32)
        out_ref[pl.ds(b, 1), :] = acc
        return carry

    jax.lax.fori_loop(0, block_b, row_body, 0)

    x = out_ref[...]
    if normalize_output:
        ss = jnp.sum(x * x, axis=-1, keepdims=True)
        out_ref[...] = x * jax.lax.rsqrt(jnp.maximum(ss, 1e-24))
    else:
        out_ref[...] = x * inv_sqrt_shifts


# --------------------------------------------------------------------------- #
# Wrapper                                                                      #
# --------------------------------------------------------------------------- #
def _round_up(x, m):
    return (x + m - 1) // m * m


def kshift_embedding(id_, emb_table, *, num_shifts=8, normalize_output=True,
                     num_bits=64, block_b=256, matmul_table_rows=512):
    """Forward pass of KShiftEmbedding.

    id_       : integer array of hashed ids, any shape (numpy int64 preferred).
    emb_table : (num_embeddings, emb_dim) float embedding table.
    block_b   : batch tile (sweep parameter; 256 suits v6e/v7x, 128 suits v5e).
    matmul_table_rows : tables with <= this many rows use the one-hot @ table MXU
                        formulation; larger tables use the SMEM-indexed gather.
    """
    emb_table = jnp.asarray(emb_table)
    num_embeddings, emb_dim = emb_table.shape
    assert num_embeddings < 2 ** 31, "row indices are stored as int32"

    ids_np = np.asarray(id_)
    orig_shape = ids_np.shape
    idx = _row_indices_np(ids_np, num_embeddings, num_shifts, num_bits)   # (B, S) int32
    b = idx.shape[0]

    # Batch tile: as large as requested, but no larger than the (8-padded) batch.
    bb = max(8, min(_round_up(block_b, 8), _round_up(b, 8)))
    pad = (-b) % bb
    if pad:
        idx = np.pad(idx, ((0, pad), (0, 0)))
    bp = idx.shape[0]
    grid = (bp // bb,)

    use_matmul = num_embeddings <= matmul_table_rows
    inv_sqrt_shifts = 1.0 / math.sqrt(num_shifts)

    # Explicit VMEM budget (default scoped limits are only 16/32 MiB).
    table_bytes = num_embeddings * emb_dim * emb_table.dtype.itemsize
    work_bytes = 2 * bb * emb_dim * 4 + 2 * bb * num_shifts * 4
    if use_matmul:
        work_bytes += 2 * bb * num_embeddings * 4
    vmem_limit = int(min(96 * 2 ** 20,
                         max(32 * 2 ** 20, table_bytes + work_bytes + 8 * 2 ** 20)))

    compiler_params = pltpu.CompilerParams(
        dimension_semantics=("parallel",), vmem_limit_bytes=vmem_limit)

    # Whole embedding table resident in VMEM as a single copy (its block never changes,
    # so it is not re-DMA'd per grid step).
    table_spec = pl.BlockSpec(memory_space=pltpu.MemorySpace.VMEM)

    if use_matmul:
        kernel = functools.partial(
            _kshift_matmul_kernel, num_shifts=num_shifts, num_embeddings=num_embeddings,
            normalize_output=normalize_output, inv_sqrt_shifts=inv_sqrt_shifts)
        out = pl.pallas_call(
            kernel,
            out_shape=jax.ShapeDtypeStruct((bp, emb_dim), jnp.float32),
            grid=grid,
            in_specs=[pl.BlockSpec((bb, num_shifts), lambda i: (i, 0)), table_spec],
            out_specs=pl.BlockSpec((bb, emb_dim), lambda i: (i, 0)),
            compiler_params=compiler_params,
        )(jnp.asarray(idx), emb_table)
    else:
        kernel = functools.partial(
            _kshift_gather_kernel, block_b=bb, num_shifts=num_shifts,
            normalize_output=normalize_output, inv_sqrt_shifts=inv_sqrt_shifts)
        grid_spec = pltpu.PrefetchScalarGridSpec(
            num_scalar_prefetch=1,                          # flat idx -> SMEM
            grid=grid,
            in_specs=[table_spec],
            out_specs=pl.BlockSpec((bb, emb_dim), lambda i, idx_sm: (i, 0)),
        )
        out = pl.pallas_call(
            kernel,
            out_shape=jax.ShapeDtypeStruct((bp, emb_dim), jnp.float32),
            grid_spec=grid_spec,
            compiler_params=compiler_params,
        )(jnp.asarray(idx.reshape(-1)), emb_table)

    return out[:b].reshape(*orig_shape, emb_dim)


# --------------------------------------------------------------------------- #
# Pure python-int / numpy reference (exact torch int64 semantics)              #
# --------------------------------------------------------------------------- #
def _reference(id_, emb_table_np, *, num_shifts=8, normalize_output=True, num_bits=64):
    emb = np.asarray(emb_table_np, dtype=np.float64)
    n, d = emb.shape
    ids = np.asarray(id_)
    flat = ids.reshape(-1)
    mask = (1 << num_bits) - 1
    half = 1 << (num_bits - 1)
    out = np.zeros((flat.shape[0], d), np.float64)
    for i, v in enumerate(int(x) for x in flat.tolist()):
        acc = np.zeros((d,), np.float64)
        for c in range(num_shifts):
            if c == 0:
                patt = v & mask
            else:
                patt = ((v << c) | (v >> (num_bits - c))) & mask
            signed = patt - (1 << num_bits) if patt >= half else patt
            acc += emb[signed % n]
        if normalize_output:
            acc = acc / max(float(np.sqrt(np.dot(acc, acc))), 1e-12)
        else:
            acc = acc / math.sqrt(num_shifts)
        out[i] = acc
    return out.reshape(*ids.shape, d)


def _make_hashed_ids(key_hi, key_lo, shape):
    """Deterministic full-range signed 64-bit hashed ids as a numpy int64 array."""
    hi = np.asarray(jax.random.bits(key_hi, shape, dtype=jnp.uint32)).astype(np.uint64)
    lo = np.asarray(jax.random.bits(key_lo, shape, dtype=jnp.uint32)).astype(np.uint64)
    return ((hi << np.uint64(32)) | lo).view(np.int64)


if __name__ == "__main__":
    key = jax.random.PRNGKey(0)
    k1, k2, k3, k4, k5, k6 = jax.random.split(key, 6)

    # Case 1: small table -> one-hot @ table MXU path, L2-normalized output.
    n1, d1, s1 = 64, 128, 8
    shape1 = (2, 8)
    emb1 = jax.random.normal(k1, (n1, d1), dtype=jnp.float32)
    id1 = _make_hashed_ids(k2, k3, shape1)
    out1 = jax.block_until_ready(
        kshift_embedding(id1, emb1, num_shifts=s1, normalize_output=True))
    ref1 = _reference(id1, np.asarray(emb1), num_shifts=s1, normalize_output=True)
    np.testing.assert_allclose(np.asarray(out1), ref1, rtol=2e-3, atol=2e-3)
    assert out1.shape == (*shape1, d1) and out1.dtype == jnp.float32

    # Case 2: larger table -> SMEM scalar-prefetch gather path (multi-tile grid).
    n2, d2, s2 = 2048, 128, 8
    shape2 = (4, 40)                        # 160 ids -> 2 grid steps at block_b=128
    emb2 = jax.random.normal(k4, (n2, d2), dtype=jnp.float32)
    id2 = _make_hashed_ids(k5, k6, shape2)
    out2 = jax.block_until_ready(
        kshift_embedding(id2, emb2, num_shifts=s2, normalize_output=True, block_b=128))
    ref2 = _reference(id2, np.asarray(emb2), num_shifts=s2, normalize_output=True)
    np.testing.assert_allclose(np.asarray(out2), ref2, rtol=2e-3, atol=2e-3)
    assert out2.shape == (*shape2, d2) and out2.dtype == jnp.float32

    # Case 3: gather path without normalization (x / sqrt(num_shifts)).
    out3 = jax.block_until_ready(
        kshift_embedding(id2, emb2, num_shifts=s2, normalize_output=False, block_b=128))
    ref3 = _reference(id2, np.asarray(emb2), num_shifts=s2, normalize_output=False)
    np.testing.assert_allclose(np.asarray(out3), ref3, rtol=2e-3, atol=2e-3)

    print("KERNEL_OK")
</pallas_src>

<mosaic_0001>
module attributes {stable_mosaic.version = 11 : i64} {
  func.func @_kshift_matmul_kernel(%arg0: i32, %arg1: memref<16x8xi32, #tpu.memory_space<vmem>>, %arg2: memref<64x128xf32, #tpu.memory_space<vmem>>, %arg3: memref<16x128xf32, #tpu.memory_space<vmem>>) attributes {dimension_semantics = [#tpu.dimension_semantics<parallel>], iteration_bounds = array<i64: 1>, scalar_prefetch = 0 : i64, scratch_operands = 0 : i64, tpu.core_type = #tpu.core_type<tc>, window_params = [{transform_indices = @transform_0, window_bounds = array<i64: 16, 8>}, {pipeline_mode = #tpu.pipeline_mode<synchronous>, transform_indices = @transform_1, window_bounds = array<i64: 64, 128>}, {transform_indices = @transform_2, window_bounds = array<i64: 16, 128>}]} {
    %c0 = arith.constant 0 : index
    %c0_0 = arith.constant 0 : index
    %0 = vector.load %arg1[%c0, %c0_0] : memref<16x8xi32, #tpu.memory_space<vmem>>, vector<16x8xi32>
    %c0_1 = arith.constant 0 : index
    %c0_2 = arith.constant 0 : index
    %1 = vector.load %arg2[%c0_1, %c0_2] : memref<64x128xf32, #tpu.memory_space<vmem>>, vector<64x128xf32>
    %2 = tpu.iota {dimensions = array<i32: 1>} : vector<16x64xi32>
    %cst = arith.constant 0.000000e+00 : f32
    %3 = vector.broadcast %cst : f32 to vector<16x64xf32>
    %4 = vector.extract_strided_slice %0 {offsets = [0, 0], sizes = [16, 1], strides = [1, 1]} : vector<16x8xi32> to vector<16x1xi32>
    %5 = vector.broadcast %4 : vector<16x1xi32> to vector<16x64xi32>
    %6 = arith.cmpi eq, %2, %5 : vector<16x64xi32>
    %7 = arith.extui %6 : vector<16x64xi1> to vector<16x64xi32>
    %8 = arith.sitofp %7 : vector<16x64xi32> to vector<16x64xf32>
    %9 = arith.addf %3, %8 : vector<16x64xf32>
    %10 = vector.extract_strided_slice %0 {offsets = [0, 1], sizes = [16, 1], strides = [1, 1]} : vector<16x8xi32> to vector<16x1xi32>
    %11 = vector.broadcast %10 : vector<16x1xi32> to vector<16x64xi32>
    %12 = arith.cmpi eq, %2, %11 : vector<16x64xi32>
    %13 = arith.extui %12 : vector<16x64xi1> to vector<16x64xi32>
    %14 = arith.sitofp %13 : vector<16x64xi32> to vector<16x64xf32>
    %15 = arith.addf %9, %14 : vector<16x64xf32>
    %16 = vector.extract_strided_slice %0 {offsets = [0, 2], sizes = [16, 1], strides = [1, 1]} : vector<16x8xi32> to vector<16x1xi32>
    %17 = vector.broadcast %16 : vector<16x1xi32> to vector<16x64xi32>
    %18 = arith.cmpi eq, %2, %17 : vector<16x64xi32>
    %19 = arith.extui %18 : vector<16x64xi1> to vector<16x64xi32>
    %20 = arith.sitofp %19 : vector<16x64xi32> to vector<16x64xf32>
    %21 = arith.addf %15, %20 : vector<16x64xf32>
    %22 = vector.extract_strided_slice %0 {offsets = [0, 3], sizes = [16, 1], strides = [1, 1]} : vector<16x8xi32> to vector<16x1xi32>
    %23 = vector.broadcast %22 : vector<16x1xi32> to vector<16x64xi32>
    %24 = arith.cmpi eq, %2, %23 : vector<16x64xi32>
    %25 = arith.extui %24 : vector<16x64xi1> to vector<16x64xi32>
    %26 = arith.sitofp %25 : vector<16x64xi32> to vector<16x64xf32>
    %27 = arith.addf %21, %26 : vector<16x64xf32>
    %28 = vector.extract_strided_slice %0 {offsets = [0, 4], sizes = [16, 1], strides = [1, 1]} : vector<16x8xi32> to vector<16x1xi32>
    %29 = vector.broadcast %28 : vector<16x1xi32> to vector<16x64xi32>
    %30 = arith.cmpi eq, %2, %29 : vector<16x64xi32>
    %31 = arith.extui %30 : vector<16x64xi1> to vector<16x64xi32>
    %32 = arith.sitofp %31 : vector<16x64xi32> to vector<16x64xf32>
    %33 = arith.addf %27, %32 : vector<16x64xf32>
    %34 = vector.extract_strided_slice %0 {offsets = [0, 5], sizes = [16, 1], strides = [1, 1]} : vector<16x8xi32> to vector<16x1xi32>
    %35 = vector.broadcast %34 : vector<16x1xi32> to vector<16x64xi32>
    %36 = arith.cmpi eq, %2, %35 : vector<16x64xi32>
    %37 = arith.extui %36 : vector<16x64xi1> to vector<16x64xi32>
    %38 = arith.sitofp %37 : vector<16x64xi32> to vector<16x64xf32>
    %39 = arith.addf %33, %38 : vector<16x64xf32>
    %40 = vector.extract_strided_slice %0 {offsets = [0, 6], sizes = [16, 1], strides = [1, 1]} : vector<16x8xi32> to vector<16x1xi32>
    %41 = vector.broadcast %40 : vector<16x1xi32> to vector<16x64xi32>
    %42 = arith.cmpi eq, %2, %41 : vector<16x64xi32>
    %43 = arith.extui %42 : vector<16x64xi1> to vector<16x64xi32>
    %44 = arith.sitofp %43 : vector<16x64xi32> to vector<16x64xf32>
    %45 = arith.addf %39, %44 : vector<16x64xf32>
    %46 = vector.extract_strided_slice %0 {offsets = [0, 7], sizes = [16, 1], strides = [1, 1]} : vector<16x8xi32> to vector<16x1xi32>
    %47 = vector.broadcast %46 : vector<16x1xi32> to vector<16x64xi32>
    %48 = arith.cmpi eq, %2, %47 : vector<16x64xi32>
    %49 = arith.extui %48 : vector<16x64xi1> to vector<16x64xi32>
    %50 = arith.sitofp %49 : vector<16x64xi32> to vector<16x64xf32>
    %51 = arith.addf %45, %50 : vector<16x64xf32>
    %cst_3 = arith.constant dense<0.000000e+00> : vector<16x128xf32>
    %52 = tpu.matmul %51, %1, %cst_3 {dimension_numbers = #tpu.dot_dimension_numbers<[1], [0], [0], [1], [0, 0, 1, 1], [], []>} : vector<16x64xf32>, vector<64x128xf32>, vector<16x128xf32> -> vector<16x128xf32>
    %53 = arith.mulf %52, %52 : vector<16x128xf32>
    %cst_4 = arith.constant dense<0.000000e+00> : vector<16xf32>
    %54 = vector.multi_reduction <add>, %53, %cst_4 [1] : vector<16x128xf32> to vector<16xf32>
    %55 = vector.shape_cast %54 : vector<16xf32> to vector<16x1xf32>
    %cst_5 = arith.constant 1.000000e-24 : f32
    %56 = vector.broadcast %cst_5 : f32 to vector<16x1xf32>
    %57 = arith.maximumf %55, %56 : vector<16x1xf32>
    %58 = math.rsqrt %57 : vector<16x1xf32>
    %59 = vector.broadcast %58 : vector<16x1xf32> to vector<16x128xf32>
    %60 = arith.mulf %52, %59 : vector<16x128xf32>
    %c0_6 = arith.constant 0 : index
    %c0_7 = arith.constant 0 : index
    %61 = vector.load %arg3[%c0_6, %c0_7] : memref<16x128xf32, #tpu.memory_space<vmem>>, vector<16x128xf32>
    tpu.vector_store %arg3[%c0_6, %c0_7], %60 {strides = array<i32>} : memref<16x128xf32, #tpu.memory_space<vmem>>, vector<16x128xf32>,
    return
  }
  func.func @transform_0(%arg0: i32) -> (i32, i32) {
    %c0_i32 = arith.constant 0 : i32
    %c0_i32_0 = arith.constant 0 : i32
    return %arg0, %c0_i32 : i32, i32
  }
  func.func @transform_1(%arg0: i32) -> (i32, i32) {
    %c0_i32 = arith.constant 0 : i32
    %c0_i32_0 = arith.constant 0 : i32
    %c0_i32_1 = arith.constant 0 : i32
    return %c0_i32, %c0_i32_0 : i32, i32
  }
  func.func @transform_2(%arg0: i32) -> (i32, i32) {
    %c0_i32 = arith.constant 0 : i32
    %c0_i32_0 = arith.constant 0 : i32
    return %arg0, %c0_i32 : i32, i32
  }
}

</mosaic_0001>

<bundles_post_ra>
// kernel: tpu_custom_call.1
= control target key start
LH: loop header
LB: loop body
LE: loop exit
PB: predicated region body
PF: predicated region fallthrough
CT: control target
= control target key end

     0   :  { %7 = vsyncpa [#allocation3], 0  ;;  %s396_s0 = inlined_call_operand.vmem [shape: s32[16,8], index: 0, kind: input, shape index: {}]   ;;  %s397_s1 = inlined_call_operand.hbm [shape: f32[64,128], index: 1, kind: input, shape index: {}]   ;;  %s398_s2 = inlined_call_operand.hbm [shape: f32[16,128], index: 2, kind: output, shape index: {}]  }
   0x1   :  { %8 = vsyncpa [#allocation4], 0  ;;  %s15_s11 = sshll.u32 %s397_s1, 4  ;;  %s342_s12 = smov [#allocation2]   ;;  %s16_s11 = int_to_ptr.hbm [resolvable:$true] %s15_s11 }
   0x2   :  { %s17_s13 = sshll.u32 %s342_s12, 4  ;;  %s343_s14 = smov 128   ;;  %s18_s13 = int_to_ptr.vmem [resolvable:$true] %s17_s13 }
   0x3   :  { %s344_s15 = smov 8  }
   0x4   :  { %23 = dma.hbm_to_vmem [thread:$0]  %s16_s11, 1024, %s18_s13, [#allocation3], %s343_s14, %s343_s14, %s344_s15  }
   0x5   :  { %338 = dma.done.wait [#allocation3], 1024  }
   0x6   :  { %339 = vsyncadd [#allocation3], 4294966272  ;;  %v345_v0 = vmov 1   ;;  %v346_v1 = vmov 0   ;;  %v347_v2 = vmov 2   ;;  %v28_v3 = vld [vmem:[%s396_s0] sm:$0xff]  ;;  %v38_v26 = vlaneseq }
   0x7   :  { %273 = vset.pattern.permute.xlu1 %v345_v0  ;;  %272 = vset.pattern.permute.xlu0 %v346_v1  ;;  %v29_v4 = vld [vmem:[%s396_s0 + $0x8] sm:$0xff]  ;;  %v348_v5 = vmov 3   ;;  %v349_v6 = vmov 4   ;;  %v350_v7 = vmov 5   ;;  %v351_v8 = vmov 6   ;;  %v37_v12 = vld [vmem:[#allocation2 + $0x38] sm:$0xff] }
   0x8   :  { %274 = vset.pattern.permute.xlu2 %v347_v2  ;;  %55 = vperm.xlu1 %273, %v28_v3   ;;  %v352_v9 = vmov 7   ;;  %v36_v13 = vld [vmem:[#allocation2 + $0x30] sm:$0xff]  ;;  %v35_v14 = vld [vmem:[#allocation2 + $0x28] sm:$0xff]  ;;  %v34_v16 = vld [vmem:[#allocation2 + $0x20] sm:$0xff]  ;;  %v39_v27 = vand.u32 127, %v38_v26  ;;  %v353_v30 = vmov 0.0  }
   0x9   :  { %41 = vperm.xlu0 %272, %v28_v3   ;;  %69 = vperm.xlu2 %274, %v28_v3   ;;  %v33_v17 = vld [vmem:[#allocation2 + $0x18] sm:$0xff]  ;;  %v32_v18 = vld [vmem:[#allocation2 + $0x10] sm:$0xff]  ;;  %v31_v21 = vld [vmem:[#allocation2 + $0x8] sm:$0xff]  ;;  %vm152_vm12 = vcmask 523264   ;;  %s354_s0 = smov [#allocation5]   ;;  %s220_s22 = sshll.u32 %s398_s2, 4  ;;  %s221_s22 = int_to_ptr.hbm [resolvable:$true] %s220_s22 }
   0xa   :  { %251 = vmatpush.msra.mxu1 %v37_v12  ;;  %167 = vmatpush.msra.mxu0 %v37_v12  ;;  %v30_v22 = vld [vmem:[#allocation2] sm:$0xff]  ;;  %s218_s19 = sshll.u32 %s354_s0, 4  ;;  %s219_s19 = int_to_ptr.vmem [resolvable:$true] %s218_s19 }
   0xc   :  { %252 = vmatpush.msra.mxu1 %v36_v13  ;;  %168 = vmatpush.msra.mxu0 %v36_v13 }
   0xe   :  { %253 = vmatpush.msra.mxu1 %v35_v14  ;;  %169 = vmatpush.msra.mxu0 %v35_v14 }
  0x10   :  { %58 = vperm.xlu1 %273, %v29_v4   ;;  %254 = vmatpush.msra.mxu1 %v34_v16 }
  0x11   :  { %44 = vperm.xlu0 %272, %v29_v4   ;;  %72 = vperm.xlu2 %274, %v29_v4  }
  0x12   :  { %170 = vmatpush.msra.mxu0 %v34_v16  ;;  %255 = vmatpush.msra.mxu1 %v33_v17 }
  0x14   :  { %171 = vmatpush.msra.mxu0 %v33_v17  ;;  %256 = vmatpush.msra.mxu1 %v32_v18 }
  0x16   :  { %172 = vmatpush.msra.mxu0 %v32_v18  ;;  %257 = vmatpush.msra.mxu1 %v31_v21 }
  0x18   :  { %276 = vset.pattern.permute.xlu1 %v348_v5  ;;  %173 = vmatpush.msra.mxu0 %v31_v21 }
  0x19   :  { %275 = vset.pattern.permute.xlu0 %v348_v5  ;;  %86 = vperm.xlu1 %276, %v29_v4  }
  0x1a   :  { %83 = vperm.xlu0 %275, %v28_v3   ;;  %277 = vset.pattern.permute.xlu2 %v349_v6 }
  0x1b   :  { %97 = vperm.xlu2 %277, %v28_v3   ;;  %258 = vmatpush.msra.mxu1 %v30_v22 }
  0x1c   :  { %174 = vmatpush.msra.mxu0 %v30_v22 }
  0x21   :  { %278 = vset.pattern.permute.xlu1 %v349_v6 }
  0x22   :  { %280 = vset.pattern.permute.xlu0 %v350_v7  ;;  %100 = vperm.xlu1 %278, %v29_v4  }
  0x23   :  { %114 = vperm.xlu0 %280, %v29_v4   ;;  %279 = vset.pattern.permute.xlu2 %v350_v7 }
  0x24   :  { %111 = vperm.xlu2 %279, %v28_v3  }
  0x2a   :  { %281 = vset.pattern.permute.xlu1 %v351_v8 }
  0x2b   :  { %285 = vset.pattern.permute.xlu0 %v352_v9  ;;  %125 = vperm.xlu1 %281, %v28_v3  }
  0x2c   :  { %282 = vset.pattern.permute.xlu2 %v351_v8 }
  0x2d   :  { %128 = vperm.xlu2 %282, %v29_v4  }
  0x33   :  { %283 = vset.pattern.permute.xlu1 %v352_v9 }
  0x34   :  { %139 = vperm.xlu1 %283, %v28_v3  }
  0x35   :  { %284 = vset.pattern.permute.xlu2 %v352_v9 }
  0x36   :  { %142 = vperm.xlu2 %284, %v29_v4  }
  0x63   :  { %v382_v10 = vpop.permute.xlu2 %69 }
  0x64   :  { %vm74_vm9 = vcmp.eq.s32.totalorder %v39_v27, %v382_v10 }
  0x65   :  { %v237_v50 = vsel %vm74_vm9, 1.0, %v353_v30 }
  0x6b   :  { %v73_v11 = vpop.permute.xlu2 %72 }
  0x6c   :  { %vm75_vm2 = vcmp.eq.s32.totalorder %v39_v27, %v73_v11 }
  0x6d   :  { %v238_v35 = vsel %vm75_vm2, 1.0, %v353_v30 }
  0x75   :  { %v384_v15 = vpop.permute.xlu2 %97 }
  0x76   :  { %vm102_vm13 = vcmp.eq.s32.totalorder %v39_v27, %v384_v15 }
  0x77   :  { %v241_v58 = vsel %vm102_vm13, 1.0, %v353_v30 }
  0x7a   :  { %v56_v19 = vpop.permute.xlu1 %55 }
  0x7b   :  { %v42_v20 = vpop.permute.xlu0 %41  ;;  %vm60_vm4 = vcmp.eq.s32.totalorder %v39_v27, %v56_v19 }
  0x7c   :  { %vm46_vm5 = vcmp.eq.s32.totalorder %v39_v27, %v42_v20  ;;  %v235_v39 = vsel %vm60_vm4, 1.0, %v353_v30 }
  0x7d   :  { %v233_v40 = vsel %vm46_vm5, 1.0, %v353_v30 }
  0x7e   :  { %v112_v23 = vpop.permute.xlu2 %111  ;;  %v66_v46 = vadd.f32 %v235_v39, %v233_v40 }
  0x7f   :  { %vm116_vm14 = vcmp.eq.s32.totalorder %v39_v27, %v112_v23 }
  0x80   :  { %v80_v53 = vadd.f32 %v237_v50, %v66_v46  ;;  %v243_v60 = vsel %vm116_vm14, 1.0, %v353_v30 }
  0x82   :  { %v59_v24 = vpop.permute.xlu1 %58 }
  0x83   :  { %v45_v25 = vpop.permute.xlu0 %44  ;;  %vm61_vm0 = vcmp.eq.s32.totalorder %v39_v27, %v59_v24 }
  0x84   :  { %vm47_vm1 = vcmp.eq.s32.totalorder %v39_v27, %v45_v25  ;;  %v236_v31 = vsel %vm61_vm0, 1.0, %v353_v30 }
  0x85   :  { %v234_v32 = vsel %vm47_vm1, 1.0, %v353_v30 }
  0x86   :  { %v67_v34 = vadd.f32 %v236_v31, %v234_v32 }
  0x87   :  { %v129_v28 = vpop.permute.xlu2 %128 }
  0x88   :  { %v81_v37 = vadd.f32 %v238_v35, %v67_v34  ;;  %vm131_vm6 = vcmp.eq.s32.totalorder %v39_v27, %v129_v28 }
  0x89   :  { %v246_v48 = vsel %vm131_vm6, 1.0, %v353_v30 }
  0x8b   :  { %v87_v29 = vpop.permute.xlu1 %86 }
  0x8c   :  { %v84_v33 = vpop.permute.xlu0 %83  ;;  %vm89_vm3 = vcmp.eq.s32.totalorder %v39_v27, %v87_v29 }
  0x8d   :  { %v240_v36 = vsel %vm89_vm3, 1.0, %v353_v30  ;;  %vm88_vm10 = vcmp.eq.s32.totalorder %v39_v27, %v84_v33 }
  0x8e   :  { %v95_v43 = vadd.f32 %v240_v36, %v81_v37  ;;  %v239_v51 = vsel %vm88_vm10, 1.0, %v353_v30 }
  0x8f   :  { %v94_v55 = vadd.f32 %v239_v51, %v80_v53 }
  0x90   :  { %v143_v38 = vpop.permute.xlu2 %142 }
  0x91   :  { %vm145_vm11 = vcmp.eq.s32.totalorder %v39_v27, %v143_v38  ;;  %v108_v59 = vadd.f32 %v241_v58, %v94_v55 }
  0x92   :  { %v248_v52 = vsel %vm145_vm11, 1.0, %v353_v30 }
  0x93   :  { %v122_v62 = vadd.f32 %v243_v60, %v108_v59 }
  0x94   :  { %v101_v41 = vpop.permute.xlu1 %100 }
  0x95   :  { %v115_v42 = vpop.permute.xlu0 %114  ;;  %vm103_vm7 = vcmp.eq.s32.totalorder %v39_v27, %v101_v41 }
  0x96   :  { %vm117_vm8 = vcmp.eq.s32.totalorder %v39_v27, %v115_v42  ;;  %v242_v44 = vsel %vm103_vm7, 1.0, %v353_v30 }
  0x97   :  { %v244_v45 = vsel %vm117_vm8, 1.0, %v353_v30  ;;  %v109_v47 = vadd.f32 %v242_v44, %v95_v43 }
  0x99   :  { %v123_v49 = vadd.f32 %v244_v45, %v109_v47 }
  0x9b   :  { %v137_v54 = vadd.f32 %v246_v48, %v123_v49 }
  0x9d   :  { %v151_v56 = vadd.f32 %v248_v52, %v137_v54  ;;  %v126_v57 = vpop.permute.xlu1 %125 }
  0x9e   :  { %vm130_vm15 = vcmp.eq.s32.totalorder %v39_v27, %v126_v57 }
  0x9f   :  { %250 = vmatmul.msk.f32.vlgmr.msra.gmra.mxu1 %vm152_vm12, %v151_v56  ;;  %v245_v61 = vsel %vm130_vm15, 1.0, %v353_v30 }
  0xa0   :  { %v136_v0 = vadd.f32 %v245_v61, %v122_v62 }
  0xa6   :  { %v140_v63 = vpop.permute.xlu1 %139 }
  0xa7   :  { %vm144_vm0 = vcmp.eq.s32.totalorder %v39_v27, %v140_v63 }
  0xa8   :  { %v247_v1 = vsel %vm144_vm0, 1.0, %v353_v30 }
  0xa9   :  { %v150_v2 = vadd.f32 %v247_v1, %v136_v0 }
  0xab   :  { %249 = vmatmul.msk.f32.vlgmr.msra.gmra.mxu0 %vm152_vm12, %v150_v2 }
 0x11c   :  { %v179_v3 = vpop.f32.mrf.mxu1 }
 0x11d   :  { %v183_v4 = vmul.f32 %v179_v3, %v179_v3 }
 0x11f   :  { %186 = vadd.xlane.f32.xlu1 %v183_v4 }
 0x128   :  { %v176_v5 = vpop.f32.mrf.mxu0 }
 0x129   :  { %v182_v6 = vmul.f32 %v176_v5, %v176_v5 }
 0x12b   :  { %184 = vadd.xlane.f32.xlu0 %v182_v6 }
 0x192   :  { %v187_v7 = vpop.xlane.xlu1 %186 }
 0x193   :  { %v189_v8 = vmax.f32 %v187_v7, 1e-24 }
 0x195   :  { %286 = vrsqrt.f32 %v189_v8  ;;  %vm206_vm2 = vweird.f32 %v189_v8 }
 0x19b   :  { %v287_v9 = vpop.eup %286 }
 0x19c   :  { %v201_v10 = vmul.f32 %v287_v9, %v189_v8  ;;  %vm207_vm1 = vweird.f32 %v287_v9 }
 0x19d   :  { %vm208_vm3 = vmor %vm206_vm2, %vm207_vm1 }
 0x19e   :  { %v202_v11 = vmul.f32 %v287_v9, %v201_v10  ;;  %v185_v12 = vpop.xlane.xlu0 %184 }
 0x19f   :  { %v188_v13 = vmax.f32 %v185_v12, 1e-24 }
 0x1a0   :  { %v203_v14 = vmul.f32 0.5, %v202_v11 }
 0x1a1   :  { %288 = vrsqrt.f32 %v188_v13  ;;  %vm196_vm5 = vweird.f32 %v188_v13 }
 0x1a2   :  { %v204_v15 = vsub.f32 1.5, %v203_v14 }
 0x1a4   :  { %v205_v16 = vmul.f32 %v287_v9, %v204_v15 }
 0x1a6   :  { %v209_v17 = vsel %vm208_vm3, %v287_v9, %v205_v16 }
 0x1a7   :  { %v289_v18 = vpop.eup %288  ;;  %v211_v19 = vmul.f32 %v209_v17, %v179_v3 }
 0x1a8   :  { %v191_v20 = vmul.f32 %v289_v18, %v188_v13  ;;  %vm197_vm4 = vweird.f32 %v289_v18 }
 0x1a9   :  { %213 = vst [vmem:[#allocation5 + $0x8] sm:$0xff] %v211_v19  ;;  %vm198_vm6 = vmor %vm196_vm5, %vm197_vm4 }
 0x1aa   :  { %v192_v21 = vmul.f32 %v289_v18, %v191_v20 }
 0x1ac   :  { %v193_v22 = vmul.f32 0.5, %v192_v21 }
 0x1ae   :  { %v194_v23 = vsub.f32 1.5, %v193_v22 }
 0x1b0   :  { %v195_v24 = vmul.f32 %v289_v18, %v194_v23 }
 0x1b2   :  { %v199_v25 = vsel %vm198_vm6, %v289_v18, %v195_v24 }
 0x1b3   :  { %v210_v26 = vmul.f32 %v199_v25, %v176_v5 }
 0x1b5   :  { %212 = vst [vmem:[#allocation5] sm:$0xff] %v210_v26 }
 0x1b6   :  { %226 = dma.vmem_to_hbm [thread:$0]  %s219_s19, 256, %s221_s22, [#allocation4], %s343_s14, %s343_s14, %s344_s15  }
 0x1b7   :  { %340 = dma.done.wait [#allocation4], 256  }
 0x1b8   :  { %341 = vsyncadd [#allocation4], 4294967040 }
 0x1b9   :  { %231 = vsyncpa [#allocation3], 1 }
 0x1ba   :  { %232 = vsyncpa [#allocation4], 1 }

</bundles_post_ra>
